<compile_context>
chip_gen: v7x
topology: tpu7x:2x2x1
jax: 0.10.0
libtpu: 0.0.40
codegen_flags: <defaults>
</compile_context>

<pallas_src>
import jax
import jax.numpy as jnp
from jax.experimental import pallas as pl
from jax.experimental.pallas import tpu as pltpu


def _round_up(x, m):
    return ((x + m - 1) // m) * m


# ---------------------------------------------------------------------------
# Kernel 1: feature transform  XW = X @ W  (hoisted out of the N^2 matmul)
# ---------------------------------------------------------------------------
def xw_kernel(x_ref, w_ref, xw_ref):
    xw = jnp.dot(x_ref[...].astype(jnp.bfloat16), w_ref[...],
                 preferred_element_type=jnp.float32)
    xw_ref[...] = xw.astype(jnp.bfloat16)


def feature_transform(x_pad, w_pad, *, tm):
    n, fp = x_pad.shape
    hp = w_pad.shape[1]
    return pl.pallas_call(
        xw_kernel,
        out_shape=jax.ShapeDtypeStruct((n, hp), jnp.bfloat16),
        grid_spec=pltpu.PrefetchScalarGridSpec(
            num_scalar_prefetch=0,
            grid=(n // tm,),
            in_specs=[pl.BlockSpec((tm, fp), lambda i: (i, 0)),
                      pl.BlockSpec((fp, hp), lambda i: (0, 0))],
            out_specs=pl.BlockSpec((tm, hp), lambda i: (i, 0)),
        ),
        compiler_params=pltpu.CompilerParams(
            dimension_semantics=("parallel",)),
        cost_estimate=pl.CostEstimate(
            flops=2 * n * fp * hp, transcendentals=0,
            bytes_accessed=n * fp * 4 + fp * hp * 2 + n * hp * 2),
    )(x_pad, w_pad)


# ---------------------------------------------------------------------------
# Kernel 2: propagation + bias + PReLU + fused global_add_pool partials
#           Z[i] = PReLU(sum_k A_hat[i,k] @ XW[k] + b) ;  G_i = P[:, i] @ Z[i]
# ---------------------------------------------------------------------------
def propagate_kernel(adj_ref, xw_ref, b_ref, alpha_ref, pool_ref,
                     z_ref, gp_ref, acc_ref):
    k = pl.program_id(1)

    @pl.when(k == 0)
    def _():
        acc_ref[...] = jnp.zeros_like(acc_ref)

    acc_ref[...] += jnp.dot(adj_ref[...], xw_ref[...],
                            preferred_element_type=jnp.float32)

    @pl.when(k == pl.num_programs(1) - 1)
    def _():
        z = acc_ref[...] + b_ref[...]
        z = jnp.where(z > 0.0, z, alpha_ref[...] * z)          # PReLU
        z_ref[...] = z
        gp_ref[...] = jnp.dot(pool_ref[...], z,                 # fused pooling
                              preferred_element_type=jnp.float32)[None]


def gcn_layer(adj_bf16, xw_bf16, b_pad, alpha_pad, pool_pad, *, tm, tk):
    n = adj_bf16.shape[0]
    hp = xw_bf16.shape[1]
    gp = pool_pad.shape[0]
    n_i, n_k = n // tm, n // tk
    z_pad, g_parts = pl.pallas_call(
        propagate_kernel,
        out_shape=(jax.ShapeDtypeStruct((n, hp), jnp.float32),
                   jax.ShapeDtypeStruct((n_i, gp, hp), jnp.float32)),
        grid_spec=pltpu.PrefetchScalarGridSpec(
            num_scalar_prefetch=0,
            grid=(n_i, n_k),
            in_specs=[
                pl.BlockSpec((tm, tk), lambda i, k: (i, k)),        # A_hat tile
                pl.BlockSpec((tk, hp), lambda i, k: (k, 0)),        # XW tile
                pl.BlockSpec((1, hp), lambda i, k: (0, 0)),         # bias
                pl.BlockSpec((1, hp), lambda i, k: (0, 0)),         # PReLU alpha
                pl.BlockSpec((gp, tm), lambda i, k: (0, i)),        # pooling slab
            ],
            out_specs=(
                pl.BlockSpec((tm, hp), lambda i, k: (i, 0)),        # Z row tile
                pl.BlockSpec((1, gp, hp), lambda i, k: (i, 0, 0)),  # pool partials
            ),
            scratch_shapes=[pltpu.VMEM((tm, hp), jnp.float32)],
        ),
        compiler_params=pltpu.CompilerParams(
            dimension_semantics=("parallel", "arbitrary"),
            vmem_limit_bytes=48 * 1024 * 1024),
        cost_estimate=pl.CostEstimate(
            flops=2 * n * n * hp + 2 * n * gp * hp,
            transcendentals=0,
            bytes_accessed=(n * n * 2 + n_i * n * hp * 2
                            + n * hp * 4 + n_i * gp * hp * 4)),
    )(adj_bf16, xw_bf16, b_pad, alpha_pad, pool_pad)
    g_pad = g_parts.sum(axis=0)            # tiny (G_pad, H_pad) reduction
    return z_pad, g_pad


# ---------------------------------------------------------------------------
# Forward pass matching GConv.forward
# ---------------------------------------------------------------------------
def gconv_forward(x, adj_norm, pool_mat, weights, biases, alpha):
    """Returns (z_last, g_concat) like the PyTorch module."""
    n = x.shape[0]
    num_graphs = pool_mat.shape[0]
    hidden_dim = weights[0].shape[1]

    hp = _round_up(hidden_dim, 128)        # lane-dense hidden dim
    gp = _round_up(num_graphs, 8)          # sublane-aligned graph dim
    tm = 128 if n % 128 == 0 else n
    tk = 128 if n % 128 == 0 else n

    # A_hat streamed as bf16 (dominant HBM stream: halves bytes + VMEM).
    adj_bf16 = adj_norm.astype(jnp.bfloat16)
    pool_pad = jnp.zeros((gp, n), jnp.float32).at[:num_graphs].set(pool_mat)
    alpha_pad = jnp.zeros((1, hp), jnp.float32).at[0, :hidden_dim].set(alpha)

    fp0 = _round_up(x.shape[1], 128)
    z_pad = jnp.zeros((n, fp0), jnp.float32).at[:, :x.shape[1]].set(x)

    gs = []
    # TODO(synk): fusing the layer loop so A_hat streams from HBM only once only
    # pays off when A_hat is fully VMEM-resident (small N); layers stay separate.
    for w, b in zip(weights, biases):
        fin = w.shape[0]
        fp = z_pad.shape[1]
        w_pad = (jnp.zeros((fp, hp), jnp.bfloat16)
                 .at[:fin, :hidden_dim].set(w.astype(jnp.bfloat16)))
        b_pad = jnp.zeros((1, hp), jnp.float32).at[0, :hidden_dim].set(b)
        xw = feature_transform(z_pad, w_pad, tm=tm)             # [N, Hp] bf16
        z_pad, g_pad = gcn_layer(adj_bf16, xw, b_pad, alpha_pad, pool_pad,
                                 tm=tm, tk=tk)
        gs.append(g_pad[:num_graphs, :hidden_dim])
    z = z_pad[:, :hidden_dim]
    g = jnp.concatenate(gs, axis=1)
    return z, g


# ---------------------------------------------------------------------------
# Plain-JAX glue (not hot path): normalized adjacency + reference
# ---------------------------------------------------------------------------
def build_normalized_adjacency(edge_index, num_nodes):
    # GCNConv normalization: A_hat = D^-1/2 (A + I) D^-1/2.
    # Duplicate edges accumulate; self loops added only where missing
    # (add_remaining_self_loops semantics).
    A = jnp.zeros((num_nodes, num_nodes), jnp.float32)
    A = A.at[edge_index[0], edge_index[1]].add(1.0)
    diag = jnp.diagonal(A)
    A = A + jnp.diag(jnp.where(diag == 0.0, 1.0, 0.0))
    deg = A.sum(axis=1)
    d_inv_sqrt = jnp.where(deg > 0, 1.0 / jnp.sqrt(deg), 0.0)
    return d_inv_sqrt[:, None] * A * d_inv_sqrt[None, :]
    # TODO(synk): for large sparse graphs replace the dense A_hat with
    # block-sparse propagation (PrefetchScalarGridSpec over per-row-tile
    # nonzero column-block lists, pl.when-skipping empty blocks).


def gconv_reference(x, adj_norm, pool_mat, weights, biases, alpha):
    z = x
    gs = []
    for w, b in zip(weights, biases):
        z = adj_norm @ (z @ w) + b[None, :]
        z = jnp.where(z > 0.0, z, alpha[None, :] * z)
        gs.append(pool_mat @ z)
    return z, jnp.concatenate(gs, axis=1)


if __name__ == "__main__":
    num_graphs = 2
    nodes_per_graph = 128
    num_nodes = num_graphs * nodes_per_graph   # 256 -> (2, 2) grid of 128x128 tiles
    input_dim = 8
    hidden_dim = 32
    num_layers = 2

    # Deterministic graph: two undirected ring graphs of 128 nodes each.
    edges = []
    for gidx in range(num_graphs):
        off = gidx * nodes_per_graph
        for i in range(nodes_per_graph):
            j = (i + 1) % nodes_per_graph
            edges.append((off + i, off + j))
            edges.append((off + j, off + i))
    edge_index = jnp.array(edges, dtype=jnp.int32).T                     # [2, E]
    batch = jnp.repeat(jnp.arange(num_graphs, dtype=jnp.int32),
                       nodes_per_graph)                                  # [N]

    key = jax.random.PRNGKey(0)
    kx, kw, kb = jax.random.split(key, 3)
    x = jax.random.normal(kx, (num_nodes, input_dim), dtype=jnp.float32)

    adj_norm = build_normalized_adjacency(edge_index, num_nodes)
    pool_mat = (batch[None, :] == jnp.arange(num_graphs)[:, None]).astype(jnp.float32)

    # Parameters: glorot-uniform weights, small random bias,
    # shared PReLU alpha = 0.25 per channel (PyTorch default).
    weights, biases = [], []
    wkeys = jax.random.split(kw, num_layers)
    bkeys = jax.random.split(kb, num_layers)
    for i in range(num_layers):
        fin = input_dim if i == 0 else hidden_dim
        limit = (6.0 / (fin + hidden_dim)) ** 0.5
        weights.append(jax.random.uniform(wkeys[i], (fin, hidden_dim),
                                          jnp.float32, -limit, limit))
        biases.append(0.1 * jax.random.normal(bkeys[i], (hidden_dim,), jnp.float32))
    alpha = jnp.full((hidden_dim,), 0.25, jnp.float32)   # shared activation

    fwd = jax.jit(gconv_forward)
    z, g = fwd(x, adj_norm, pool_mat, weights, biases, alpha)
    jax.block_until_ready((z, g))

    assert z.shape == (num_nodes, hidden_dim)
    assert g.shape == (num_graphs, hidden_dim * num_layers)

    # Sanity check vs. f32 reference (loose tol: bf16 MXU operands, f32 accum).
    z_ref, g_ref = gconv_reference(x, adj_norm, pool_mat, weights, biases, alpha)
    assert bool(jnp.allclose(z, z_ref, rtol=1e-1, atol=1e-1)), "z mismatch"
    assert bool(jnp.allclose(g, g_ref, rtol=1e-1, atol=5e-1)), "g mismatch"

    print("KERNEL_OK")
</pallas_src>

<mosaic_0001>
module attributes {stable_mosaic.version = 11 : i64} {
  func.func @propagate_kernel(%arg0: i32, %arg1: i32, %arg2: memref<128x128xbf16, #tpu.memory_space<vmem>>, %arg3: memref<128x128xbf16, #tpu.memory_space<vmem>>, %arg4: memref<1x128xf32, #tpu.memory_space<vmem>>, %arg5: memref<1x128xf32, #tpu.memory_space<vmem>>, %arg6: memref<8x128xf32, #tpu.memory_space<vmem>>, %arg7: memref<128x128xf32, #tpu.memory_space<vmem>>, %arg8: memref<1x8x128xf32, #tpu.memory_space<vmem>>, %arg9: memref<128x128xf32, #tpu.memory_space<vmem>>) attributes {dimension_semantics = [#tpu.dimension_semantics<parallel>, #tpu.dimension_semantics<arbitrary>], iteration_bounds = array<i64: 2, 2>, scalar_prefetch = 0 : i64, scratch_operands = 1 : i64, tpu.core_type = #tpu.core_type<tc>, window_params = [{transform_indices = @transform_0, window_bounds = array<i64: 128, 128>}, {transform_indices = @transform_1, window_bounds = array<i64: 128, 128>}, {pipeline_mode = #tpu.pipeline_mode<synchronous>, transform_indices = @transform_2, window_bounds = array<i64: 1, 128>}, {pipeline_mode = #tpu.pipeline_mode<synchronous>, transform_indices = @transform_3, window_bounds = array<i64: 1, 128>}, {transform_indices = @transform_4, window_bounds = array<i64: 8, 128>}, {transform_indices = @transform_5, window_bounds = array<i64: 128, 128>}, {transform_indices = @transform_6, window_bounds = array<i64: 1, 8, 128>}]} {
    %c0_i32 = arith.constant 0 : i32
    %0 = arith.cmpi eq, %arg1, %c0_i32 : i32
    %1 = arith.extui %0 : i1 to i32
    %c0_i32_0 = arith.constant 0 : i32
    %2 = arith.cmpi ne, %1, %c0_i32_0 : i32
    scf.if %2 {
      %cst_9 = arith.constant 0.000000e+00 : f32
      %12 = vector.broadcast %cst_9 : f32 to vector<128x128xf32>
      %c0_10 = arith.constant 0 : index
      %c0_11 = arith.constant 0 : index
      %13 = vector.load %arg9[%c0_10, %c0_11] : memref<128x128xf32, #tpu.memory_space<vmem>>, vector<128x128xf32>
      tpu.vector_store %arg9[%c0_10, %c0_11], %12 {strides = array<i32>} : memref<128x128xf32, #tpu.memory_space<vmem>>, vector<128x128xf32>,
    } else {
    }
    %c0 = arith.constant 0 : index
    %c0_1 = arith.constant 0 : index
    %3 = vector.load %arg9[%c0, %c0_1] : memref<128x128xf32, #tpu.memory_space<vmem>>, vector<128x128xf32>
    %c0_2 = arith.constant 0 : index
    %c0_3 = arith.constant 0 : index
    %4 = vector.load %arg2[%c0_2, %c0_3] : memref<128x128xbf16, #tpu.memory_space<vmem>>, vector<128x128xbf16>
    %c0_4 = arith.constant 0 : index
    %c0_5 = arith.constant 0 : index
    %5 = vector.load %arg3[%c0_4, %c0_5] : memref<128x128xbf16, #tpu.memory_space<vmem>>, vector<128x128xbf16>
    %cst = arith.constant dense<0.000000e+00> : vector<128x128xf32>
    %6 = tpu.matmul %4, %5, %cst {dimension_numbers = #tpu.dot_dimension_numbers<[1], [0], [0], [1], [0, 0, 1, 1], [], []>} : vector<128x128xbf16>, vector<128x128xbf16>, vector<128x128xf32> -> vector<128x128xf32>
    %7 = arith.addf %3, %6 : vector<128x128xf32>
    %c0_6 = arith.constant 0 : index
    %c0_7 = arith.constant 0 : index
    %8 = vector.load %arg9[%c0_6, %c0_7] : memref<128x128xf32, #tpu.memory_space<vmem>>, vector<128x128xf32>
    tpu.vector_store %arg9[%c0_6, %c0_7], %7 {strides = array<i32>} : memref<128x128xf32, #tpu.memory_space<vmem>>, vector<128x128xf32>,
    %c1_i32 = arith.constant 1 : i32
    %9 = arith.cmpi eq, %arg1, %c1_i32 : i32
    %10 = arith.extui %9 : i1 to i32
    %c0_i32_8 = arith.constant 0 : i32
    %11 = arith.cmpi ne, %10, %c0_i32_8 : i32
    scf.if %11 {
      %c0_9 = arith.constant 0 : index
      %c0_10 = arith.constant 0 : index
      %12 = vector.load %arg9[%c0_9, %c0_10] : memref<128x128xf32, #tpu.memory_space<vmem>>, vector<128x128xf32>
      %c0_11 = arith.constant 0 : index
      %c0_12 = arith.constant 0 : index
      %13 = vector.load %arg4[%c0_11, %c0_12] : memref<1x128xf32, #tpu.memory_space<vmem>>, vector<1x128xf32>
      %14 = vector.broadcast %13 : vector<1x128xf32> to vector<128x128xf32>
      %15 = arith.addf %12, %14 : vector<128x128xf32>
      %cst_13 = arith.constant 0.000000e+00 : f32
      %16 = vector.broadcast %cst_13 : f32 to vector<128x128xf32>
      %17 = arith.cmpf ogt, %15, %16 : vector<128x128xf32>
      %c0_14 = arith.constant 0 : index
      %c0_15 = arith.constant 0 : index
      %18 = vector.load %arg5[%c0_14, %c0_15] : memref<1x128xf32, #tpu.memory_space<vmem>>, vector<1x128xf32>
      %19 = vector.broadcast %18 : vector<1x128xf32> to vector<128x128xf32>
      %20 = arith.mulf %19, %15 : vector<128x128xf32>
      %21 = arith.select %17, %15, %20 : vector<128x128xi1>, vector<128x128xf32>
      %c0_16 = arith.constant 0 : index
      %c0_17 = arith.constant 0 : index
      %22 = vector.load %arg7[%c0_16, %c0_17] : memref<128x128xf32, #tpu.memory_space<vmem>>, vector<128x128xf32>
      tpu.vector_store %arg7[%c0_16, %c0_17], %21 {strides = array<i32>} : memref<128x128xf32, #tpu.memory_space<vmem>>, vector<128x128xf32>,
      %c0_18 = arith.constant 0 : index
      %c0_19 = arith.constant 0 : index
      %23 = vector.load %arg6[%c0_18, %c0_19] : memref<8x128xf32, #tpu.memory_space<vmem>>, vector<8x128xf32>
      %cst_20 = arith.constant dense<0.000000e+00> : vector<8x128xf32>
      %24 = tpu.matmul %23, %21, %cst_20 {dimension_numbers = #tpu.dot_dimension_numbers<[1], [0], [0], [1], [0, 0, 1, 1], [], []>} : vector<8x128xf32>, vector<128x128xf32>, vector<8x128xf32> -> vector<8x128xf32>
      %25 = vector.shape_cast %24 : vector<8x128xf32> to vector<1x8x128xf32>
      %c0_21 = arith.constant 0 : index
      %c0_22 = arith.constant 0 : index
      %c0_23 = arith.constant 0 : index
      %26 = vector.load %arg8[%c0_21, %c0_22, %c0_23] : memref<1x8x128xf32, #tpu.memory_space<vmem>>, vector<1x8x128xf32>
      tpu.vector_store %arg8[%c0_21, %c0_22, %c0_23], %25 {strides = array<i32>} : memref<1x8x128xf32, #tpu.memory_space<vmem>>, vector<1x8x128xf32>,
    } else {
    }
    return
  }
  func.func @transform_0(%arg0: i32, %arg1: i32) -> (i32, i32) {
    %c0_i32 = arith.constant 0 : i32
    return %arg0, %arg1 : i32, i32
  }
  func.func @transform_1(%arg0: i32, %arg1: i32) -> (i32, i32) {
    %c0_i32 = arith.constant 0 : i32
    %c0_i32_0 = arith.constant 0 : i32
    return %arg1, %c0_i32 : i32, i32
  }
  func.func @transform_2(%arg0: i32, %arg1: i32) -> (i32, i32) {
    %c0_i32 = arith.constant 0 : i32
    %c0_i32_0 = arith.constant 0 : i32
    %c0_i32_1 = arith.constant 0 : i32
    return %c0_i32, %c0_i32_0 : i32, i32
  }
  func.func @transform_3(%arg0: i32, %arg1: i32) -> (i32, i32) {
    %c0_i32 = arith.constant 0 : i32
    %c0_i32_0 = arith.constant 0 : i32
    %c0_i32_1 = arith.constant 0 : i32
    return %c0_i32, %c0_i32_0 : i32, i32
  }
  func.func @transform_4(%arg0: i32, %arg1: i32) -> (i32, i32) {
    %c0_i32 = arith.constant 0 : i32
    %c0_i32_0 = arith.constant 0 : i32
    return %c0_i32, %arg0 : i32, i32
  }
  func.func @transform_5(%arg0: i32, %arg1: i32) -> (i32, i32) {
    %c0_i32 = arith.constant 0 : i32
    %c0_i32_0 = arith.constant 0 : i32
    return %arg0, %c0_i32 : i32, i32
  }
  func.func @transform_6(%arg0: i32, %arg1: i32) -> (i32, i32, i32) {
    %c0_i32 = arith.constant 0 : i32
    %c0_i32_0 = arith.constant 0 : i32
    %c0_i32_1 = arith.constant 0 : i32
    return %arg0, %c0_i32, %c0_i32_0 : i32, i32, i32
  }
}

module attributes {stable_mosaic.version = 11 : i64} {
  func.func @xw_kernel(%arg0: i32, %arg1: memref<128x128xf32, #tpu.memory_space<vmem>>, %arg2: memref<128x128xbf16, #tpu.memory_space<vmem>>, %arg3: memref<128x128xbf16, #tpu.memory_space<vmem>>) attributes {dimension_semantics = [#tpu.dimension_semantics<parallel>], iteration_bounds = array<i64: 2>, scalar_prefetch = 0 : i64, scratch_operands = 0 : i64, tpu.core_type = #tpu.core_type<tc>, window_params = [{transform_indices = @transform_0, window_bounds = array<i64: 128, 128>}, {pipeline_mode = #tpu.pipeline_mode<synchronous>, transform_indices = @transform_1, window_bounds = array<i64: 128, 128>}, {transform_indices = @transform_2, window_bounds = array<i64: 128, 128>}]} {
    %c0 = arith.constant 0 : index
    %c0_0 = arith.constant 0 : index
    %0 = vector.load %arg1[%c0, %c0_0] : memref<128x128xf32, #tpu.memory_space<vmem>>, vector<128x128xf32>
    %1 = arith.truncf %0 : vector<128x128xf32> to vector<128x128xbf16>
    %c0_1 = arith.constant 0 : index
    %c0_2 = arith.constant 0 : index
    %2 = vector.load %arg2[%c0_1, %c0_2] : memref<128x128xbf16, #tpu.memory_space<vmem>>, vector<128x128xbf16>
    %cst = arith.constant dense<0.000000e+00> : vector<128x128xf32>
    %3 = tpu.matmul %1, %2, %cst {dimension_numbers = #tpu.dot_dimension_numbers<[1], [0], [0], [1], [0, 0, 1, 1], [], []>} : vector<128x128xbf16>, vector<128x128xbf16>, vector<128x128xf32> -> vector<128x128xf32>
    %4 = arith.truncf %3 : vector<128x128xf32> to vector<128x128xbf16>
    %c0_3 = arith.constant 0 : index
    %c0_4 = arith.constant 0 : index
    %5 = vector.load %arg3[%c0_3, %c0_4] : memref<128x128xbf16, #tpu.memory_space<vmem>>, vector<128x128xbf16>
    tpu.vector_store %arg3[%c0_3, %c0_4], %4 {strides = array<i32>} : memref<128x128xbf16, #tpu.memory_space<vmem>>, vector<128x128xbf16>,
    return
  }
  func.func @transform_0(%arg0: i32) -> (i32, i32) {
    %c0_i32 = arith.constant 0 : i32
    %c0_i32_0 = arith.constant 0 : i32
    return %arg0, %c0_i32 : i32, i32
  }
  func.func @transform_1(%arg0: i32) -> (i32, i32) {
    %c0_i32 = arith.constant 0 : i32
    %c0_i32_0 = arith.constant 0 : i32
    %c0_i32_1 = arith.constant 0 : i32
    return %c0_i32, %c0_i32_0 : i32, i32
  }
  func.func @transform_2(%arg0: i32) -> (i32, i32) {
    %c0_i32 = arith.constant 0 : i32
    %c0_i32_0 = arith.constant 0 : i32
    return %arg0, %c0_i32 : i32, i32
  }
}

</mosaic_0001>

<bundles_post_ra>
// kernel: gconv_forward.4
= control target key start
LH: loop header
LB: loop body
LE: loop exit
PB: predicated region body
PF: predicated region fallthrough
CT: control target
= control target key end

     0   :  { %s670_s9 = smov 0   ;;  %s733_s0 = inlined_call_operand.vmem [shape: f32[256,128], index: 0, kind: input, shape index: {}]   ;;  %s734_s1 = inlined_call_operand.vmem [shape: bf16[128,128], index: 1, kind: input, shape index: {}]   ;;  %s735_s2 = inlined_call_operand.vmem [shape: bf16[256,128], index: 2, kind: output, shape index: {}]  }
   0x1 LB: > { %s469_s10 = sadd.s32 4294967295, %s653_s9   ;;  %p473_p0 = scmp.ge.s32.totalorder %s653_s9, 1  ;;  %s653_s9 = sphi %s670_s9, %s12_s9  }
   0x2   : > { %p113_p1 = scmp.lt.s32.totalorder %s653_s9, 3 }
   0x4   : > { %p114_p2 = pnand %p473_p0, %p113_p1 }
   0x5   : > { %v639_v0 = vld [vmem:[%s734_s1] sm:$0xff] (!%p114_p2)   ;;  %s474_s13 = sshll.u32 (!%p114_p2), %s469_s10, 4  ;;  %v640_v1 = vld [vmem:[%s734_s1 + $0x8] sm:$0xff] (!%p114_p2)   ;;  %v641_v2 = vld [vmem:[%s734_s1 + $0x10] sm:$0xff] (!%p114_p2)  }
   0x6   : > { %117 = sbr.rel (%p114_p2) target bundleno = 265 (0x109), region = 28  ;;  %p136_p3 = scmp.lt.s32.totalorder (!%p114_p2), %s474_s13, 31  ;;  %583 = vmatprep.subr.bf16.mxu0 (!%p114_p2), %v639_v0  ;;  %615 = vmatprep.subr.bf16.mxu1 (!%p114_p2), %v639_v0  ;;  %v642_v3 = vld [vmem:[%s734_s1 + $0x18] sm:$0xff] (!%p114_p2)   ;;  %v643_v10 = vld [vmem:[%s734_s1 + $0x20] sm:$0xff] (!%p114_p2)   ;;  %v644_v11 = vld [vmem:[%s734_s1 + $0x28] sm:$0xff] (!%p114_p2)  }
   0x7   : > { %584 = vmatpush3.bf16.msra.mxu0 (!%p114_p2), %v639_v0  ;;  %623 = vmatpush3.bf16.msra.mxu1 (!%p114_p2), %v639_v0  ;;  %v645_v12 = vld [vmem:[%s734_s1 + $0x30] sm:$0xff] (!%p114_p2)   ;;  %v646_v13 = vld [vmem:[%s734_s1 + $0x38] sm:$0xff] (!%p114_p2)  }
   0x8   : > { %585 = vmatprep.subr.bf16.mxu0 (!%p114_p2), %v640_v1  ;;  %616 = vmatprep.subr.bf16.mxu1 (!%p114_p2), %v640_v1 }
   0xb   : > { %586 = vmatpush3.bf16.msra.mxu0 (!%p114_p2), %v640_v1  ;;  %624 = vmatpush3.bf16.msra.mxu1 (!%p114_p2), %v640_v1 }
   0xc   : > { %587 = vmatprep.subr.bf16.mxu0 (!%p114_p2), %v641_v2  ;;  %617 = vmatprep.subr.bf16.mxu1 (!%p114_p2), %v641_v2 }
   0xd   : > { %s737_s13 = smov (!%p136_p3, %s474_s13), 31 }
   0xe   : > { %s475_s18 = sshll.u32 %s737_s13, 3  ;;  %s477_s4 = sshll.u32 %s737_s13, 2 }
   0xf   : > { %s693_s21 = scalar_lea.vmem %s733_s0, %s475_s18  ;;  %588 = vmatpush3.bf16.msra.mxu0 %v641_v2  ;;  %625 = vmatpush3.bf16.msra.mxu1 %v641_v2  ;;  %s145_s7 = scalar_lea.vmem %s735_s2, %s477_s4 }
  0x10   : > { %v148_v4 = vld [vmem:[%s693_s21] sm:$0xff]  ;;  %v149_v5 = vld [vmem:[%s693_s21 + $0x8] sm:$0xff]  ;;  %589 = vmatprep.subr.bf16.mxu0 %v642_v3  ;;  %618 = vmatprep.subr.bf16.mxu1 %v642_v3  ;;  %v150_v14 = vld [vmem:[%s693_s21 + $0x10] sm:$0xff] }
  0x11   : > { %v156_v6 = vld [vmem:[%s693_s21 + $0x40] sm:$0xff]  ;;  %v164_v7 = vpack.c.bf16 %v149_v5, %v148_v4  ;;  %v157_v8 = vld [vmem:[%s693_s21 + $0x48] sm:$0xff]  ;;  %v151_v15 = vld [vmem:[%s693_s21 + $0x18] sm:$0xff] }
  0x12   : > { %v168_v9 = vpack.c.bf16 %v157_v8, %v156_v6  ;;  %v158_v16 = vld [vmem:[%s693_s21 + $0x50] sm:$0xff]  ;;  %v159_v17 = vld [vmem:[%s693_s21 + $0x58] sm:$0xff]  ;;  %v152_v18 = vld [vmem:[%s693_s21 + $0x20] sm:$0xff]  ;;  %v165_v22 = vpack.c.bf16 %v151_v15, %v150_v14 }
  0x13   : > { %599 = vmatprep.mubr.bf16.mxu0 %v164_v7  ;;  %590 = vmatpush3.bf16.msra.mxu0 %v642_v3  ;;  %v153_v19 = vld [vmem:[%s693_s21 + $0x28] sm:$0xff]  ;;  %v160_v20 = vld [vmem:[%s693_s21 + $0x60] sm:$0xff]  ;;  %v169_v23 = vpack.c.bf16 %v159_v17, %v158_v16  ;;  %v154_v26 = vld [vmem:[%s693_s21 + $0x30] sm:$0xff] }
  0x14   : > { %607 = vmatprep.mubr.bf16.mxu1 %v168_v9  ;;  %626 = vmatpush3.bf16.msra.mxu1 %v642_v3  ;;  %v161_v21 = vld [vmem:[%s693_s21 + $0x68] sm:$0xff]  ;;  %v166_v24 = vpack.c.bf16 %v153_v19, %v152_v18  ;;  %v155_v27 = vld [vmem:[%s693_s21 + $0x38] sm:$0xff]  ;;  %v162_v28 = vld [vmem:[%s693_s21 + $0x70] sm:$0xff] }
  0x15   : > { %591 = vmatprep.subr.bf16.mxu0 %v643_v10  ;;  %619 = vmatprep.subr.bf16.mxu1 %v643_v10  ;;  %v170_v25 = vpack.c.bf16 %v161_v21, %v160_v20  ;;  %v163_v29 = vld [vmem:[%s693_s21 + $0x78] sm:$0xff]  ;;  %v167_v30 = vpack.c.bf16 %v155_v27, %v154_v26 }
  0x16   : > { %v171_v31 = vpack.c.bf16 %v163_v29, %v162_v28 }
  0x17   : > { %592 = vmatpush3.bf16.msra.mxu0 %v643_v10 }
  0x18   : > { %627 = vmatpush3.bf16.msra.mxu1 %v643_v10  ;;  %593 = vmatprep.subr.bf16.mxu0 %v644_v11 }
  0x19   : > { %620 = vmatprep.subr.bf16.mxu1 %v644_v11 }
  0x1b   : > { %594 = vmatpush3.bf16.msra.mxu0 %v644_v11 }
  0x1c   : > { %628 = vmatpush3.bf16.msra.mxu1 %v644_v11  ;;  %595 = vmatprep.subr.bf16.mxu0 %v645_v12 }
  0x1d   : > { %621 = vmatprep.subr.bf16.mxu1 %v645_v12 }
  0x1f   : > { %596 = vmatpush3.bf16.msra.mxu0 %v645_v12 }
  0x20   : > { %629 = vmatpush3.bf16.msra.mxu1 %v645_v12  ;;  %597 = vmatprep.subr.bf16.mxu0 %v646_v13 }
  0x21   : > { %622 = vmatprep.subr.bf16.mxu1 %v646_v13 }
  0x23   : > { %598 = vmatpush3.bf16.msra.mxu0 %v646_v13 }
  0x24   : > { %630 = vmatpush3.bf16.msra.mxu1 %v646_v13 }
  0x26   : > { %600 = vmatmul.mubr.bf16.vlgmr.msra.gmra.mrb[0].mxu0 %v165_v22 }
  0x27   : > { %608 = vmatmul.mubr.bf16.vlgmr.msra.gmra.mrb[0].mxu1 %v169_v23  ;;  %603 = vmatprep.mubr.bf16.mxu0 %v166_v24 }
  0x28   : > { %611 = vmatprep.mubr.bf16.mxu1 %v170_v25 }
  0x2e   : > { %604 = vmatmul.mubr.bf16.gmra.mrb[4].mxu0 %v167_v30 }
  0x2f   : > { %612 = vmatmul.mubr.bf16.gmra.mrb[4].mxu1 %v171_v31 }
  0xf9   : > { %v601_v32 = vpop.f32.mrb[0].mxu0 }
  0xfa   : > { %v609_v33 = vpop.f32.mrb[0].mxu1  ;;  %v270_v34 = vpop.f32.mrb[1].mxu0 }
  0xfb   : > { %v302_v35 = vpop.f32.mrb[1].mxu1  ;;  %v602_v36 = vpop.f32.mrb[2].mxu0 }
  0xfc   : > { %v610_v37 = vpop.f32.mrb[2].mxu1  ;;  %v528_v38 = vpack.c.bf16 %v602_v36, %v601_v32  ;;  %v273_v40 = vpop.f32.mrb[3].mxu0 }
  0xfd   : > { %v548_v39 = vpack.c.bf16 %v610_v37, %v609_v33  ;;  %v305_v41 = vpop.f32.mrb[3].mxu1  ;;  %v523_v42 = vpack.c.bf16 %v273_v40, %v270_v34 }
  0xfe   : > { %v543_v43 = vpack.c.bf16 %v305_v41, %v302_v35  ;;  %560 = vst [vmem:[%s145_s7 + $0x8] sm:$0xff] %v528_v38  }
  0xff   : > { %564 = vst [vmem:[%s145_s7 + $0x28] sm:$0xff] %v548_v39   ;;  %524 = vst [vmem:[%s145_s7] sm:$0xff] %v523_v42  }
 0x100   : > { %563 = vst [vmem:[%s145_s7 + $0x20] sm:$0xff] %v543_v43  }
 0x101   : > { %v605_v44 = vpop.f32.mrb[4].mxu0 }
 0x102   : > { %v613_v45 = vpop.f32.mrb[4].mxu1  ;;  %v286_v46 = vpop.f32.mrb[5].mxu0 }
 0x103   : > { %v318_v47 = vpop.f32.mrb[5].mxu1  ;;  %v606_v48 = vpop.f32.mrb[6].mxu0 }
 0x104   : > { %v614_v49 = vpop.f32.mrb[6].mxu1  ;;  %v538_v50 = vpack.c.bf16 %v606_v48, %v605_v44  ;;  %v289_v52 = vpop.f32.mrb[7].mxu0 }
 0x105   : > { %v558_v51 = vpack.c.bf16 %v614_v49, %v613_v45  ;;  %v321_v53 = vpop.f32.mrb[7].mxu1  ;;  %v533_v54 = vpack.c.bf16 %v289_v52, %v286_v46 }
 0x106   : > { %v553_v55 = vpack.c.bf16 %v321_v53, %v318_v47  ;;  %562 = vst [vmem:[%s145_s7 + $0x18] sm:$0xff] %v538_v50  }
 0x107   : > { %566 = vst [vmem:[%s145_s7 + $0x38] sm:$0xff] %v558_v51   ;;  %561 = vst [vmem:[%s145_s7 + $0x10] sm:$0xff] %v533_v54  }
 0x108   : > { %565 = vst [vmem:[%s145_s7 + $0x30] sm:$0xff] %v553_v55  }
 0x109 PF: > { %s12_s9 = sadd.s32 1, %s653_s9  }
 0x10a   : > { %p9_p4 = scmp.ge.s32.totalorder %s12_s9, 4  }
 0x10c   :  { %11 = sbr.rel (!%p9_p4) target bundleno = 1 (0x1), region = 58 }

// kernel: gconv_forward.5
= control target key start
LH: loop header
LB: loop body
LE: loop exit
PB: predicated region body
PF: predicated region fallthrough
CT: control target
= control target key end

     0   :  { %s1597_s0 = inlined_call_operand.vmem [shape: bf16[256,256], index: 0, kind: input, shape index: {}]   ;;  %s1598_s1 = inlined_call_operand.vmem [shape: bf16[256,128], index: 1, kind: input, shape index: {}]   ;;  %s1599_s2 = inlined_call_operand.vmem [shape: f32[1,128], index: 2, kind: input, shape index: {}]   ;;  %s1600_s3 = inlined_call_operand.vmem [shape: f32[1,128], index: 3, kind: input, shape index: {}]   ;;  %s1601_s4 = inlined_call_operand.vmem [shape: f32[8,256], index: 4, kind: input, shape index: {}]   ;;  %s1602_s5 = inlined_call_operand.vmem [shape: f32[256,128], index: 5, kind: output, shape index: {0}]   ;;  %s1603_s6 = inlined_call_operand.vmem [shape: f32[2,8,128], index: 6, kind: output, shape index: {1}]  }
   0x1   :  { %1604 = sst [smem:[#allocation4_spill]] %s1597_s0 }
   0x2   :  { %s1383_s21 = smov 0   ;;  %s1385_s22 = smov 0  }
   0x3   :  { %s1387_s23 = smov 0   ;;  %s1389_s24 = smov 0  }
   0x4   :  { %s1391_s25 = smov 0   ;;  %s1393_s26 = smov 0  }
   0x5   :  { %s1395_s27 = smov 0  }
   0x6 LB: > { %s26_s28 = sadd.s32 1, %s1334_s25  ;;  %s29_s29 = sadd.s32 1, %s1338_s26  ;;  %s1342_s27 = sphi %s1395_s27, %s17_s27   ;;  %s1338_s26 = sphi %s1393_s26, %s1611_s26   ;;  %s1334_s25 = sphi %s1391_s25, %s1610_s25   ;;  %s1330_s24 = sphi %s1389_s24, %s1609_s24   ;;  %s1326_s23 = sphi %s1387_s23, %s1608_s23   ;;  %s1322_s22 = sphi %s1385_s22, %s1607_s22   ;;  %s1318_s21 = sphi %s1383_s21, %s1606_s21  }
   0x7   : > { %p27_p0 = scmp.ge.s32.totalorder %s26_s28, 2  ;;  %p45_p1 = scmp.ne.s32.totalorder %s1322_s22, %s1318_s21 }
   0x8   : > { %p46_p2 = scmp.eq.s32.totalorder %s1342_s27, 0  ;;  %s38_s9 = sadd.s32 1, %s1322_s22 }
   0x9   : > { %s1613_s28 = smov (%p27_p0, %s26_s28), 0  ;;  %s1615_s29 = smov (!%p27_p0, %s29_s29), %s1338_s26 }
   0xa   : > { %p47_p3 = por %p46_p2, %p45_p1  ;;  %p31_p4 = scmp.ge.s32.totalorder %s1615_s29, 2 }
   0xb   : > { %s34_s30 = ssub.s32 %s1334_s25, %s1613_s28  ;;  %p1036_p6 = scmp.ge.s32.totalorder %s1342_s27, 4 }
   0xc   : > { %s1617_s29 = smov (%p31_p4, %s1615_s29), 0 }
   0xd   : > { %s33_s7 = ssub.s32 %s1338_s26, %s1617_s29  ;;  %223 = sbr.rel (%p1036_p6) target bundleno = 40 (0x28), region = 24 }
   0xe   : > { %s35_s8 = sor.u32 %s34_s30, %s33_s7 }
   0xf   : > { %p36_p5 = scmp.eq.s32.totalorder %s35_s8, 0 }
  0x11   : > { %s1434_s10 = scalar_select %p36_p5, %s1322_s22, %s38_s9  }
  0x14   : > { %226 = sbr.rel (!%p47_p3) target bundleno = 40 (0x28), region = 28  ;;  %s228_s11 = sand.u32 (%p47_p3), 1, %s1322_s22  }
  0x15   : > { %s1071_s12 = sshll.u32 (%p47_p3), %s1338_s26, 5  ;;  %s1037_s13 = sshll.u32 (%p47_p3), %s228_s11, 6 }
  0x16   : > { %s233_s14 = sadd.s32 (%p47_p3), %s1334_s25, %s1071_s12  ;;  %s1605_s0 = sld [smem:[#allocation4_spill]] (%p47_p3) }
  0x17   : > { %s1040_s15 = sshll.u32 (%p47_p3), %s233_s14, 2  ;;  %s230_s19 = scalar_lea.vmem (%p47_p3), [#allocation3], %s1037_s13 }
  0x1c   : > { %s1443_s18 = scalar_lea.vmem %s1605_s0, %s1040_s15 }
  0x1d   : > { %v251_v0 = vld [vmem:[%s1443_s18] sm:$0xf]  ;;  %v253_v1 = vld [vmem:[%s1443_s18 + $0x8] sm:$0xf]  ;;  %v255_v2 = vld [vmem:[%s1443_s18 + $0x10] sm:$0xf] }
  0x1e   : > { %252 = vst [vmem:[%s230_s19] sm:$0xf] %v251_v0  ;;  %254 = vst [vmem:[%s230_s19 + $0x4] sm:$0xf] %v253_v1  ;;  %v257_v3 = vld [vmem:[%s1443_s18 + $0x18] sm:$0xf] }
  0x1f   : > { %256 = vst [vmem:[%s230_s19 + $0x8] sm:$0xf] %v255_v2  ;;  %v259_v4 = vld [vmem:[%s1443_s18 + $0x20] sm:$0xf]  ;;  %v261_v5 = vld [vmem:[%s1443_s18 + $0x28] sm:$0xf] }
  0x20   : > { %258 = vst [vmem:[%s230_s19 + $0xc] sm:$0xf] %v257_v3  ;;  %260 = vst [vmem:[%s230_s19 + $0x10] sm:$0xf] %v259_v4  ;;  %v263_v6 = vld [vmem:[%s1443_s18 + $0x30] sm:$0xf] }
  0x21   : > { %262 = vst [vmem:[%s230_s19 + $0x14] sm:$0xf] %v261_v5  ;;  %v265_v7 = vld [vmem:[%s1443_s18 + $0x38] sm:$0xf]  ;;  %v267_v8 = vld [vmem:[%s1443_s18 + $0x40] sm:$0xf] }
  0x22   : > { %264 = vst [vmem:[%s230_s19 + $0x18] sm:$0xf] %v263_v6  ;;  %266 = vst [vmem:[%s230_s19 + $0x1c] sm:$0xf] %v265_v7  ;;  %v269_v9 = vld [vmem:[%s1443_s18 + $0x48] sm:$0xf] }
  0x23   : > { %268 = vst [vmem:[%s230_s19 + $0x20] sm:$0xf] %v267_v8  ;;  %v271_v10 = vld [vmem:[%s1443_s18 + $0x50] sm:$0xf]  ;;  %v273_v11 = vld [vmem:[%s1443_s18 + $0x58] sm:$0xf] }
  0x24   : > { %270 = vst [vmem:[%s230_s19 + $0x24] sm:$0xf] %v269_v9  ;;  %272 = vst [vmem:[%s230_s19 + $0x28] sm:$0xf] %v271_v10  ;;  %v275_v12 = vld [vmem:[%s1443_s18 + $0x60] sm:$0xf] }
  0x25   : > { %274 = vst [vmem:[%s230_s19 + $0x2c] sm:$0xf] %v273_v11  ;;  %v277_v13 = vld [vmem:[%s1443_s18 + $0x68] sm:$0xf]  ;;  %v279_v14 = vld [vmem:[%s1443_s18 + $0x70] sm:$0xf] }
  0x26   : > { %276 = vst [vmem:[%s230_s19 + $0x30] sm:$0xf] %v275_v12  ;;  %278 = vst [vmem:[%s230_s19 + $0x34] sm:$0xf] %v277_v13  ;;  %v281_v15 = vld [vmem:[%s1443_s18 + $0x78] sm:$0xf] }
  0x27   : > { %280 = vst [vmem:[%s230_s19 + $0x38] sm:$0xf] %v279_v14  ;;  %282 = vst [vmem:[%s230_s19 + $0x3c] sm:$0xf] %v281_v15 }
  0x28 PF: > { %p1041_p7 = scmp.ge.s32.totalorder %s1342_s27, 1  ;;  %p352_p8 = scmp.lt.s32.totalorder %s1342_s27, 5 }
  0x2a   : > { %p353_p9 = pnand %p1041_p7, %p352_p8 }
  0x2b   : > { %s359_s20 = sand.u32 (!%p353_p9), 1, %s1318_s21   ;;  %s1043_s30 = sshll.u32 (!%p353_p9), %s1326_s23, 4 }
  0x2c   : > { %356 = sbr.rel (%p353_p9) target bundleno = 573 (0x23d), region = 77  ;;  %s1042_s7 = sshll.u32 (!%p353_p9), %s359_s20, 6 }
  0x2d   : > { %p403_p10 = scmp.lt.s32.totalorder (!%p353_p9), %s1043_s30, 31  ;;  %p408_p11 = scmp.lt.s32.totalorder (!%p353_p9), %s1330_s24, 1 }
  0x2e   : > { %s1046_s11 = sshll.u32 (!%p353_p9), %s1330_s24, 4  ;;  %p1049_p13 = scmp.ne.s32.totalorder (!%p353_p9), %s1326_s23, 0 }
  0x2f   : > { %p413_p12 = scmp.lt.s32.totalorder (!%p353_p9), %s1046_s11, 31 }
  0x33   : > { %s1619_s30 = smov (!%p403_p10, %s1043_s30), 31  ;;  %s1621_s11 = smov (!%p413_p12, %s1046_s11), 31 }
  0x34   : > { %s409_s8 = scalar_select %p408_p11, %s1330_s24, 1 }
  0x35   : > { %s1044_s9 = sshll.u32 %s1619_s30, 2  ;;  %s1047_s30 = sshll.u32 %s1621_s11, 3  ;;  %v1344_v16 = vmov (!%p1049_p13), 0.0  }
  0x36   : > { %s1471_s14 = scalar_lea.vmem %s1598_s1, %s1044_s9  ;;  %s1045_s15 = sshll.u32 %s409_s8, 3  ;;  %427 = vst [vmem:[#allocation2] sm:$0xff] (!%p1049_p13), %v1344_v16  ;;  %428 = vst [vmem:[#allocation2 + $0x8] sm:$0xff] (!%p1049_p13), %v1344_v16 }
  0x37   : > { %s1476_s18 = scalar_lea.vmem %s1601_s4, %s1045_s15  ;;  %s1481_s20 = scalar_lea.vmem %s1603_s6, %s1045_s15  ;;  %429 = vst [vmem:[#allocation2 + $0x10] sm:$0xff] (!%p1049_p13), %v1344_v16  ;;  %430 = vst [vmem:[#allocation2 + $0x18] sm:$0xff] (!%p1049_p13), %v1344_v16 }
  0x38   : > { %s1486_s12 = scalar_lea.vmem %s1602_s5, %s1047_s30  ;;  %s1488_s9 = scalar_lea.vmem [#allocation3], %s1042_s7  ;;  %431 = vst [vmem:[#allocation2 + $0x20] sm:$0xff] (!%p1049_p13), %v1344_v16  ;;  %432 = vst [vmem:[#allocation2 + $0x28] sm:$0xff] (!%p1049_p13), %v1344_v16 }
  0x39   : > { %426 = sbr.rel (%p1049_p13) target bundleno = 64 (0x40), region = 85  ;;  %433 = vst [vmem:[#allocation2 + $0x30] sm:$0xff] (!%p1049_p13), %v1344_v16  ;;  %434 = vst [vmem:[#allocation2 + $0x38] sm:$0xff] (!%p1049_p13), %v1344_v16 }
  0x3a   : > { %435 = vst [vmem:[#allocation2 + $0x40] sm:$0xff] (!%p1049_p13), %v1344_v16  ;;  %436 = vst [vmem:[#allocation2 + $0x48] sm:$0xff] (!%p1049_p13), %v1344_v16 }
  0x3b   : > { %437 = vst [vmem:[#allocation2 + $0x50] sm:$0xff] (!%p1049_p13), %v1344_v16  ;;  %438 = vst [vmem:[#allocation2 + $0x58] sm:$0xff] (!%p1049_p13), %v1344_v16 }
  0x3c   : > { %439 = vst [vmem:[#allocation2 + $0x60] sm:$0xff] (!%p1049_p13), %v1344_v16  ;;  %440 = vst [vmem:[#allocation2 + $0x68] sm:$0xff] (!%p1049_p13), %v1344_v16 }
  0x3d   : > { %441 = vst [vmem:[#allocation2 + $0x70] sm:$0xff] (!%p1049_p13), %v1344_v16  ;;  %442 = vst [vmem:[#allocation2 + $0x78] sm:$0xff] (!%p1049_p13), %v1344_v16 }
  0x40 PF: > { %v1272_v17 = vld [vmem:[%s1471_s14] sm:$0xff]   ;;  %v1273_v18 = vld [vmem:[%s1471_s14 + $0x8] sm:$0xff]   ;;  %v1274_v19 = vld [vmem:[%s1471_s14 + $0x10] sm:$0xff]   ;;  %p1066_p0 = scmp.ne.s32.totalorder %s1326_s23, 1 }
  0x41   : > { %1105 = vmatprep.subr.bf16.mxu0 %v1272_v17  ;;  %1196 = vmatprep.subr.bf16.mxu1 %v1272_v17  ;;  %v1275_v20 = vld [vmem:[%s1471_s14 + $0x18] sm:$0xff]   ;;  %v1280_v21 = vld [vmem:[%s1488_s9] sm:$0xff]   ;;  %v1277_v24 = vld [vmem:[%s1471_s14 + $0x28] sm:$0xff]   ;;  %vm1346_vm0 = vmmov (!%p1066_p0), 0  }
  0x42   : > { %1106 = vmatpush3.bf16.msra.mxu0 %v1272_v17  ;;  %1204 = vmatpush3.bf16.msra.mxu1 %v1272_v17  ;;  %v1281_v22 = vld [vmem:[%s1488_s9 + $0x20] sm:$0xff]   ;;  %v1278_v25 = vld [vmem:[%s1471_s14 + $0x30] sm:$0xff]   ;;  %v1279_v26 = vld [vmem:[%s1471_s14 + $0x38] sm:$0xff]  }
  0x43   : > { %1107 = vmatprep.subr.bf16.mxu0 %v1273_v18  ;;  %1197 = vmatprep.subr.bf16.mxu1 %v1273_v18  ;;  %v1276_v23 = vld [vmem:[%s1471_s14 + $0x20] sm:$0xff]   ;;  %v1282_v27 = vld [vmem:[%s1488_s9 + $0x8] sm:$0xff]   ;;  %v1284_v29 = vld [vmem:[%s1488_s9 + $0x10] sm:$0xff]  }
  0x44   : > { %1121 = vmatprep.mubr.bf16.mxu0 %v1280_v21  ;;  %1129 = vmatprep.mubr.bf16.mxu1 %v1281_v22  ;;  %v1283_v28 = vld [vmem:[%s1488_s9 + $0x28] sm:$0xff]   ;;  %v1285_v30 = vld [vmem:[%s1488_s9 + $0x30] sm:$0xff]   ;;  %v1286_v31 = vld [vmem:[%s1488_s9 + $0x18] sm:$0xff]  }
  0x45   : > { %v1287_v32 = vld [vmem:[%s1488_s9 + $0x38] sm:$0xff]   ;;  %v445_v33 = vld [vmem:[#allocation2 + $0x10] sm:$0xff]  ;;  %v443_v35 = vld [vmem:[#allocation2] sm:$0xff] }
  0x46   : > { %1108 = vmatpush3.bf16.msra.mxu0 %v1273_v18  ;;  %1205 = vmatpush3.bf16.msra.mxu1 %v1273_v18  ;;  %v453_v34 = vld [vmem:[#allocation2 + $0x50] sm:$0xff]  ;;  %v451_v36 = vld [vmem:[#allocation2 + $0x40] sm:$0xff]  ;;  %v446_v39 = vld [vmem:[#allocation2 + $0x18] sm:$0xff] }
  0x47   : > { %1109 = vmatprep.subr.bf16.mxu0 %v1274_v19  ;;  %1198 = vmatprep.subr.bf16.mxu1 %v1274_v19  ;;  %v454_v40 = vld [vmem:[#allocation2 + $0x58] sm:$0xff]  ;;  %v444_v45 = vld [vmem:[#allocation2 + $0x8] sm:$0xff]  ;;  %v449_v57 = vld [vmem:[#allocation2 + $0x30] sm:$0xff] }
  0x48   : > { %v452_v46 = vld [vmem:[#allocation2 + $0x48] sm:$0xff]  ;;  %v457_v58 = vld [vmem:[#allocation2 + $0x70] sm:$0xff]  ;;  %v447_v59 = vld [vmem:[#allocation2 + $0x20] sm:$0xff] }
  0x49   : > { %v455_v60 = vld [vmem:[#allocation2 + $0x60] sm:$0xff]  ;;  %v450_v63 = vld [vmem:[#allocation2 + $0x38] sm:$0xff]  ;;  %v448_v5 = vld [vmem:[#allocation2 + $0x28] sm:$0xff] }
  0x4a   : > { %1110 = vmatpush3.bf16.msra.mxu0 %v1274_v19  ;;  %1206 = vmatpush3.bf16.msra.mxu1 %v1274_v19  ;;  %v458_v0 = vld [vmem:[#allocation2 + $0x78] sm:$0xff]  ;;  %v456_v6 = vld [vmem:[#allocation2 + $0x68] sm:$0xff]  ;;  %v1511_v19 = vld [vmem:[%s1599_s2] ss:$0 sm:$0xff] (!%p1066_p0) }
  0x4b   : > { %1111 = vmatprep.subr.bf16.mxu0 %v1275_v20  ;;  %1199 = vmatprep.subr.bf16.mxu1 %v1275_v20 }
  0x4e   : > { %1112 = vmatpush3.bf16.msra.mxu0 %v1275_v20  ;;  %1207 = vmatpush3.bf16.msra.mxu1 %v1275_v20  ;;  %v1345_v20 = vmov (!%p1066_p0), 0.0|0.0  }
  0x4f   : > { %1113 = vmatprep.subr.bf16.mxu0 %v1276_v23  ;;  %1200 = vmatprep.subr.bf16.mxu1 %v1276_v23 }
  0x52   : > { %1114 = vmatpush3.bf16.msra.mxu0 %v1276_v23  ;;  %1208 = vmatpush3.bf16.msra.mxu1 %v1276_v23  ;;  %v1519_v23 = vld [vmem:[%s1600_s3] ss:$0 sm:$0xff] (!%p1066_p0) }
  0x53   : > { %1115 = vmatprep.subr.bf16.mxu0 %v1277_v24  ;;  %1201 = vmatprep.subr.bf16.mxu1 %v1277_v24 }
  0x56   : > { %1116 = vmatpush3.bf16.msra.mxu0 %v1277_v24  ;;  %1209 = vmatpush3.bf16.msra.mxu1 %v1277_v24 }
  0x57   : > { %1117 = vmatprep.subr.bf16.mxu0 %v1278_v25  ;;  %1202 = vmatprep.subr.bf16.mxu1 %v1278_v25 }
  0x5a   : > { %1118 = vmatpush3.bf16.msra.mxu0 %v1278_v25  ;;  %1210 = vmatpush3.bf16.msra.mxu1 %v1278_v25 }
  0x5b   : > { %1119 = vmatprep.subr.bf16.mxu0 %v1279_v26  ;;  %1203 = vmatprep.subr.bf16.mxu1 %v1279_v26 }
  0x5e   : > { %1120 = vmatpush3.bf16.msra.mxu0 %v1279_v26  ;;  %1211 = vmatpush3.bf16.msra.mxu1 %v1279_v26 }
  0x5f   : > { %1172 = vmatprep.subr.bf16.mxu0 (!%p1066_p0), %v1345_v20 }
  0x61   : > { %1122 = vmatmul.mubr.bf16.vlgmr.msra.gmra.mrb[0].mxu0 %v1282_v27  ;;  %1130 = vmatmul.mubr.bf16.vlgmr.msra.gmra.mrb[0].mxu1 %v1283_v28 }
  0x62   : > { %1125 = vmatprep.mubr.bf16.mxu0 %v1284_v29  ;;  %1133 = vmatprep.mubr.bf16.mxu1 %v1285_v30  ;;  %v1347_v30 = vmov (!%p1066_p0), 0.0  }
  0x69   : > { %1126 = vmatmul.mubr.bf16.gmra.mrb[4].mxu0 %v1286_v31  ;;  %1134 = vmatmul.mubr.bf16.gmra.mrb[4].mxu1 %v1287_v32 }
  0x6a   : > { %1169 = vmatprep.mubr.msk.f32.mxu0 (!%p1066_p0), %vm1346_vm0, %v1347_v30  ;;  %v830_v30 = vld [vmem:[%s1476_s18] sm:$0xff] (!%p1066_p0) }
 0x134   : > { %v1123_v37 = vpop.f32.mrb[0].mxu0  ;;  %v1131_v38 = vpop.f32.mrb[0].mxu1 }
 0x135   : > { %v686_v41 = vadd.f32 %v1123_v37, %v445_v33  ;;  %v694_v42 = vadd.f32 %v1131_v38, %v453_v34  ;;  %v621_v43 = vpop.f32.mrb[1].mxu0  ;;  %v653_v44 = vpop.f32.mrb[1].mxu1 }
 0x136   : > { %v684_v47 = vadd.f32 %v621_v43, %v443_v35  ;;  %v692_v48 = vadd.f32 %v653_v44, %v451_v36  ;;  %v1124_v49 = vpop.f32.mrb[2].mxu0  ;;  %v1132_v50 = vpop.f32.mrb[2].mxu1 }
 0x137   : > { %702 = vst [vmem:[#allocation2 + $0x10] sm:$0xff] %v686_v41  ;;  %710 = vst [vmem:[#allocation2 + $0x50] sm:$0xff] %v694_v42  ;;  %v687_v51 = vadd.f32 %v1124_v49, %v446_v39  ;;  %v695_v52 = vadd.f32 %v1132_v50, %v454_v40  ;;  %v624_v53 = vpop.f32.mrb[3].mxu0  ;;  %v656_v54 = vpop.f32.mrb[3].mxu1 }
 0x138   : > { %700 = vst [vmem:[#allocation2] sm:$0xff] %v684_v47  ;;  %708 = vst [vmem:[#allocation2 + $0x40] sm:$0xff] %v692_v48  ;;  %v685_v55 = vadd.f32 %v624_v53, %v444_v45  ;;  %v693_v56 = vadd.f32 %v656_v54, %v452_v46 }
 0x139   : > { %703 = vst [vmem:[#allocation2 + $0x18] sm:$0xff] %v687_v51  ;;  %711 = vst [vmem:[#allocation2 + $0x58] sm:$0xff] %v695_v52 }
 0x13a   : > { %701 = vst [vmem:[#allocation2 + $0x8] sm:$0xff] %v685_v55  ;;  %709 = vst [vmem:[#allocation2 + $0x48] sm:$0xff] %v693_v56 }
 0x13c   : > { %v1127_v61 = vpop.f32.mrb[4].mxu0  ;;  %v1135_v62 = vpop.f32.mrb[4].mxu1  ;;  %719 = sbr.rel (%p1066_p0) target bundleno = 573 (0x23d), region = 89 }
 0x13d   : > { %v690_v1 = vadd.f32 %v1127_v61, %v449_v57  ;;  %v698_v2 = vadd.f32 %v1135_v62, %v457_v58  ;;  %v637_v3 = vpop.f32.mrb[5].mxu0  ;;  %v669_v4 = vpop.f32.mrb[5].mxu1 }
 0x13e   : > { %v688_v7 = vadd.f32 %v637_v3, %v447_v59  ;;  %v696_v8 = vadd.f32 %v669_v4, %v455_v60  ;;  %v1128_v9 = vpop.f32.mrb[6].mxu0  ;;  %v1136_v10 = vpop.f32.mrb[6].mxu1  ;;  %v722_v24 = vld [vmem:[#allocation2 + $0x10] sm:$0xff] (!%p1066_p0) }
 0x13f   : > { %706 = vst [vmem:[#allocation2 + $0x30] sm:$0xff] %v690_v1  ;;  %714 = vst [vmem:[#allocation2 + $0x70] sm:$0xff] %v698_v2  ;;  %v691_v11 = vadd.f32 %v1128_v9, %v450_v63  ;;  %v699_v12 = vadd.f32 %v1136_v10, %v458_v0  ;;  %v640_v13 = vpop.f32.mrb[7].mxu0  ;;  %v672_v14 = vpop.f32.mrb[7].mxu1  ;;  %v720_v17 = vld [vmem:[#allocation2] sm:$0xff] (!%p1066_p0)  ;;  %v745_v26 = vadd.f32 (!%p1066_p0), %v1511_v19, %v722_v24  ;;  %v730_v47 = vld [vmem:[#allocation2 + $0x50] sm:$0xff] (!%p1066_p0) }
 0x140   : > { %704 = vst [vmem:[#allocation2 + $0x20] sm:$0xff] %v688_v7  ;;  %712 = vst [vmem:[#allocation2 + $0x60] sm:$0xff] %v696_v8  ;;  %v689_v15 = vadd.f32 %v640_v13, %v448_v5  ;;  %v697_v16 = vadd.f32 %v672_v14, %v456_v6  ;;  %v743_v21 = vadd.f32 (!%p1066_p0), %v1511_v19, %v720_v17  ;;  %v723_v25 = vld [vmem:[#allocation2 + $0x18] sm:$0xff] (!%p1066_p0)  ;;  %v728_v45 = vld [vmem:[#allocation2 + $0x40] sm:$0xff] (!%p1066_p0) }
 0x141   : > { %707 = vst [vmem:[#allocation2 + $0x38] sm:$0xff] %v691_v11  ;;  %715 = vst [vmem:[#allocation2 + $0x78] sm:$0xff] %v699_v12  ;;  %v721_v18 = vld [vmem:[#allocation2 + $0x8] sm:$0xff] (!%p1066_p0)  ;;  %v746_v27 = vadd.f32 (!%p1066_p0), %v1511_v19, %v723_v25  ;;  %vm761_vm3 = vcmp.gt.f32.partialorder (!%p1066_p0), %v745_v26, 0.0  ;;  %v784_v34 = vmul.f32 (!%p1066_p0), %v1519_v23, %v745_v26  ;;  %v751_v54 = vadd.f32 (!%p1066_p0), %v1511_v19, %v728_v45  ;;  %v731_v56 = vld [vmem:[#allocation2 + $0x58] sm:$0xff] (!%p1066_p0) }
 0x142   : > { %705 = vst [vmem:[#allocation2 + $0x28] sm:$0xff] %v689_v15  ;;  %713 = vst [vmem:[#allocation2 + $0x68] sm:$0xff] %v697_v16  ;;  %v744_v22 = vadd.f32 (!%p1066_p0), %v1511_v19, %v721_v18  ;;  %vm759_vm1 = vcmp.gt.f32.partialorder (!%p1066_p0), %v743_v21, 0.0  ;;  %v782_v31 = vmul.f32 (!%p1066_p0), %v1519_v23, %v743_v21  ;;  %v729_v46 = vld [vmem:[#allocation2 + $0x48] sm:$0xff] (!%p1066_p0)  ;;  %v753_v57 = vadd.f32 (!%p1066_p0), %v1511_v19, %v730_v47 }
 0x143   : > { %vm762_vm4 = vcmp.gt.f32.partialorder %v746_v27, 0.0  ;;  %v785_v35 = vmul.f32 %v1519_v23, %v746_v27  ;;  %v800_v42 = vsel %vm761_vm3, %v745_v26, %v784_v34  ;;  %v752_v55 = vadd.f32 %v1511_v19, %v729_v46 }
 0x144   : > { %vm760_vm2 = vcmp.gt.f32.partialorder %v744_v22, 0.0  ;;  %v783_v32 = vmul.f32 %v1519_v23, %v744_v22  ;;  %v798_v36 = vsel %vm759_vm1, %v743_v21, %v782_v31  ;;  %816 = vst [vmem:[%s1486_s12 + $0x10] sm:$0xff] %v800_v42  ;;  %vm767_vm9 = vcmp.gt.f32.partialorder %v751_v54, 0.0 }
 0x145   : > { %814 = vst [vmem:[%s1486_s12] sm:$0xff] %v798_v36  ;;  %v801_v43 = vsel %vm762_vm4, %v746_v27, %v785_v35  ;;  %vm768_vm10 = vcmp.gt.f32.partialorder %v752_v55, 0.0  ;;  %v790_v63 = vmul.f32 %v1519_v23, %v751_v54  ;;  %v791_v2 = vmul.f32 %v1519_v23, %v752_v55 }
 0x146   : > { %v726_v33 = vld [vmem:[#allocation2 + $0x30] sm:$0xff]  ;;  %v799_v37 = vsel %vm760_vm2, %v744_v22, %v783_v32  ;;  %817 = vst [vmem:[%s1486_s12 + $0x18] sm:$0xff] %v801_v43  ;;  %v1176_v48 = vpack.c.bf16 %v801_v43, %v800_v42  ;;  %v754_v3 = vadd.f32 %v1511_v19, %v731_v56  ;;  %vm769_vm11 = vcmp.gt.f32.partialorder %v753_v57, 0.0 }
 0x147   : > { %v724_v28 = vld [vmem:[#allocation2 + $0x20] sm:$0xff]  ;;  %815 = vst [vmem:[%s1486_s12 + $0x8] sm:$0xff] %v799_v37  ;;  %v1173_v41 = vpack.c.bf16 %v799_v37, %v798_v36  ;;  %v749_v44 = vadd.f32 %v1511_v19, %v726_v33  ;;  %v806_v4 = vsel %vm767_vm9, %v751_v54, %v790_v63  ;;  %v792_v5 = vmul.f32 %v1519_v23, %v753_v57  ;;  %v734_v7 = vld [vmem:[#allocation2 + $0x70] sm:$0xff] }
 0x148   : > { %v747_v38 = vadd.f32 %v1511_v19, %v724_v28  ;;  %v727_v40 = vld [vmem:[#allocation2 + $0x38] sm:$0xff]  ;;  %v732_v61 = vld [vmem:[#allocation2 + $0x60] sm:$0xff]  ;;  %v807_v8 = vsel %vm768_vm10, %v752_v55, %v791_v2  ;;  %822 = vst [vmem:[%s1486_s12 + $0x40] sm:$0xff] %v806_v4  ;;  %vm770_vm12 = vcmp.gt.f32.partialorder %v754_v3, 0.0  ;;  %v793_v9 = vmul.f32 %v1519_v23, %v754_v3 }
 0x149   : > { %v725_v29 = vld [vmem:[#allocation2 + $0x28] sm:$0xff]  ;;  %1174 = vmatpush3.bf16.msra.mxu0 %v1173_v41  ;;  %v750_v51 = vadd.f32 %v1511_v19, %v727_v40  ;;  %vm765_vm7 = vcmp.gt.f32.partialorder %v749_v44, 0.0  ;;  %v788_v52 = vmul.f32 %v1519_v23, %v749_v44  ;;  %v755_v6 = vadd.f32 %v1511_v19, %v732_v61  ;;  %v735_v11 = vld [vmem:[#allocation2 + $0x78] sm:$0xff]  ;;  %823 = vst [vmem:[%s1486_s12 + $0x48] sm:$0xff] %v807_v8 }
 0x14a   : > { %v748_v39 = vadd.f32 %v1511_v19, %v725_v29  ;;  %vm763_vm5 = vcmp.gt.f32.partialorder %v747_v38, 0.0  ;;  %v786_v49 = vmul.f32 %v1519_v23, %v747_v38  ;;  %1175 = vmatprep.subr.bf16.mxu0 %v1345_v20  ;;  %v733_v0 = vld [vmem:[#allocation2 + $0x68] sm:$0xff]  ;;  %v808_v13 = vsel %vm769_vm11, %v753_v57, %v792_v5 }
 0x14b   : > { %vm766_vm8 = vcmp.gt.f32.partialorder %v750_v51, 0.0  ;;  %v789_v59 = vmul.f32 %v1519_v23, %v750_v51  ;;  %v804_v60 = vsel %vm765_vm7, %v749_v44, %v788_v52  ;;  %v756_v10 = vadd.f32 %v1511_v19, %v733_v0  ;;  %824 = vst [vmem:[%s1486_s12 + $0x50] sm:$0xff] %v808_v13 }
 0x14c   : > { %vm764_vm6 = vcmp.gt.f32.partialorder %v748_v39, 0.0  ;;  %v787_v50 = vmul.f32 %v1519_v23, %v748_v39  ;;  %v802_v53 = vsel %vm763_vm5, %v747_v38, %v786_v49  ;;  %820 = vst [vmem:[%s1486_s12 + $0x30] sm:$0xff] %v804_v60  ;;  %vm771_vm13 = vcmp.gt.f32.partialorder %v755_v6, 0.0 }
 0x14d   : > { %818 = vst [vmem:[%s1486_s12 + $0x20] sm:$0xff] %v802_v53  ;;  %1177 = vmatpush3.bf16.msra.mxu0 %v1176_v48  ;;  %v805_v1 = vsel %vm766_vm8, %v750_v51, %v789_v59  ;;  %v794_v14 = vmul.f32 %v1519_v23, %v755_v6  ;;  %v809_v15 = vsel %vm770_vm12, %v754_v3, %v793_v9  ;;  %vm772_vm14 = vcmp.gt.f32.partialorder %v756_v10, 0.0 }
 0x14e   : > { %v803_v58 = vsel %vm764_vm6, %v748_v39, %v787_v50  ;;  %1178 = vmatprep.subr.bf16.mxu0 %v1345_v20  ;;  %821 = vst [vmem:[%s1486_s12 + $0x38] sm:$0xff] %v805_v1  ;;  %v1182_v12 = vpack.c.bf16 %v805_v1, %v804_v60  ;;  %v795_v16 = vmul.f32 %v1519_v23, %v756_v10  ;;  %825 = vst [vmem:[%s1486_s12 + $0x58] sm:$0xff] %v809_v15 }
 0x14f   : > { %819 = vst [vmem:[%s1486_s12 + $0x28] sm:$0xff] %v803_v58  ;;  %v1179_v62 = vpack.c.bf16 %v803_v58, %v802_v53  ;;  %v757_v17 = vadd.f32 %v1511_v19, %v734_v7  ;;  %v810_v18 = vsel %vm771_vm13, %v755_v6, %v794_v14  ;;  %v758_v21 = vadd.f32 %v1511_v19, %v735_v11 }
 0x150   : > { %v811_v22 = vsel %vm772_vm14, %v756_v10, %v795_v16  ;;  %826 = vst [vmem:[%s1486_s12 + $0x60] sm:$0xff] %v810_v18  ;;  %v1185_v26 = vpack.c.bf16 %v807_v8, %v806_v4  ;;  %v1188_v19 = vpack.c.bf16 %v809_v15, %v808_v13 }
 0x151   : > { %1180 = vmatpush3.bf16.msra.mxu0 %v1179_v62  ;;  %vm773_vm15 = vcmp.gt.f32.partialorder %v757_v17, 0.0  ;;  %v796_v24 = vmul.f32 %v1519_v23, %v757_v17  ;;  %827 = vst [vmem:[%s1486_s12 + $0x68] sm:$0xff] %v811_v22  ;;  %vm774_vm0 = vcmp.gt.f32.partialorder %v758_v21, 0.0  ;;  %v797_v25 = vmul.f32 %v1519_v23, %v758_v21 }
 0x152   : > { %1181 = vmatprep.subr.bf16.mxu0 %v1345_v20  ;;  %v1191_v29 = vpack.c.bf16 %v811_v22, %v810_v18 }
 0x153   : > { %v812_v27 = vsel %vm773_vm15, %v757_v17, %v796_v24  ;;  %v813_v28 = vsel %vm774_vm0, %v758_v21, %v797_v25 }
 0x154   : > { %828 = vst [vmem:[%s1486_s12 + $0x70] sm:$0xff] %v812_v27  ;;  %829 = vst [vmem:[%s1486_s12 + $0x78] sm:$0xff] %v813_v28  ;;  %v1194_v23 = vpack.c.bf16 %v813_v28, %v812_v27 }
 0x155   : > { %1183 = vmatpush3.bf16.msra.mxu0 %v1182_v12 }
 0x156   : > { %1184 = vmatprep.subr.bf16.mxu0 %v1345_v20 }
 0x159   : > { %1186 = vmatpush3.bf16.msra.mxu0 %v1185_v26 }
 0x15a   : > { %1187 = vmatprep.subr.bf16.mxu0 %v1345_v20 }
 0x15d   : > { %1189 = vmatpush3.bf16.msra.mxu0 %v1188_v19 }
 0x15e   : > { %1190 = vmatprep.subr.bf16.mxu0 %v1345_v20 }
 0x161   : > { %1192 = vmatpush3.bf16.msra.mxu0 %v1191_v29 }
 0x162   : > { %1193 = vmatprep.subr.bf16.mxu0 %v1345_v20 }
 0x165   : > { %1195 = vmatpush3.bf16.msra.mxu0 %v1194_v23 }
 0x168   : > { %1170 = vmatmul.mubr.f32.vlgmr.msra.gmra.mrb[0].mxu0 %v830_v30 }
 0x23b   : > { %v897_v31 = vpop.f32.mrb[0].mxu0 }
 0x23c   : > { %901 = vst [vmem:[%s1481_s20] sm:$0xff] %v897_v31  ;;  %v1171_v32 = vpop.f32.mrb[1].mxu0 }
 0x23d PF: > { %s17_s27 = sadd.s32 1, %s1342_s27   ;;  %s1606_s21 = smov %s1322_s22 }
 0x23e   : > { %p14_p1 = scmp.ge.s32.totalorder %s17_s27, 6   ;;  %s1607_s22 = smov %s1434_s10 }
 0x23f   : > { %s1608_s23 = smov %s1334_s25  ;;  %s1609_s24 = smov %s1338_s26 }
 0x240   : > { %s1610_s25 = smov %s1613_s28  ;;  %s1611_s26 = smov %s1617_s29 }
 0x241   :  { %16 = sbr.rel (!%p14_p1) target bundleno = 6 (0x6), region = 142 }

</bundles_post_ra>
